<compile_context>
chip_gen: v7x
topology: tpu7x:2x2x1
jax: 0.10.0
libtpu: 0.0.40
codegen_flags: <defaults>
</compile_context>

<pallas_src>
import functools
import numpy as np

import jax
import jax.numpy as jnp
from jax.experimental import pallas as pl
from jax.experimental.pallas import tpu as pltpu


# The 16 relaxed binary logic gates, each expressed as an affine function of
# (1, a, b, a*b):  gate_g(a, b) = c0 + c1*a + c2*b + c3*(a*b)
_GATE_COEFFS = np.array([
    [0,  0,  0,  0],   # FALSE
    [0,  0,  0,  1],   # a AND b
    [0,  1,  0, -1],   # a AND NOT b
    [0,  1,  0,  0],   # a
    [0,  0,  1, -1],   # NOT a AND b
    [0,  0,  1,  0],   # b
    [0,  1,  1, -2],   # a XOR b
    [0,  1,  1, -1],   # a OR b
    [1, -1, -1,  1],   # NOR
    [1, -1, -1,  2],   # XNOR
    [1,  0, -1,  0],   # NOT b
    [1,  0, -1,  1],   # a OR NOT b
    [1, -1,  0,  0],   # NOT a
    [1, -1,  0,  1],   # NOT a OR b
    [1,  0,  0, -1],   # NAND
    [1,  0,  0,  0],   # TRUE
], dtype=np.float32)
GATE_COEFFS = jnp.asarray(_GATE_COEFFS)            # [16, 4]

PERC_SIZES = [(8, 9), (4, 8), (2, 4), (1, 2)]      # (out, in) per layer


# ----------------------------------------------------------------------------
# Fused Pallas kernel: all 4 differentiable-logic layers in one body.
#   coeffs_ref : SMEM f32 [4 * (8+4+2+1)] = [60]  (c0,c1,c2,c3 per node)
#   x_ref      : VMEM f32 [9, TB]  (features on sublanes, batch on lanes)
#   out_ref    : VMEM f32 [1, TB]
#   wiring     : static python tuple of (a_idx, b_idx) per layer (baked in)
# ----------------------------------------------------------------------------
def _perception_fused_kernel(coeffs_ref, x_ref, out_ref, *, wiring):
    # Current-layer activations as a list of (1, TB) lane-dense rows.
    rows = [x_ref[i:i + 1, :] for i in range(x_ref.shape[0])]
    node = 0
    for a_idx, b_idx in wiring:
        new_rows = []
        for j in range(len(a_idx)):
            a = rows[a_idx[j]]                     # static sublane slice
            b = rows[b_idx[j]]
            base = 4 * node
            c0 = coeffs_ref[base + 0]              # SMEM scalars -> lane bcast
            c1 = coeffs_ref[base + 1]
            c2 = coeffs_ref[base + 2]
            c3 = coeffs_ref[base + 3]
            # c0 + c1*a + c2*b + c3*(a*b)  ==  c0 + c2*b + a*(c1 + c3*b)
            new_rows.append(c0 + c2 * b + a * (c1 + c3 * b))
            node += 1
        rows = new_rows
    out_ref[...] = rows[0]                         # [1, TB], lane-dense store


def perception_forward(x, weights, *, wiring, temperature=1.0, lane_tile=512):
    """PerceptionKernel forward: x [B, 9] f32 -> [B, 1] f32."""
    batch, d_in = x.shape
    inv_t = 1.0 / float(temperature)

    # Parameter-only precompute hoisted out of the kernel:
    #   per node: softmax(w / T) @ GATE_COEFFS -> 4 scalars; flattened to one
    #   1-D f32 table (15 nodes * 4 = 60 scalars) that lives in SMEM.
    coeffs = jnp.concatenate(
        [jnp.dot(jax.nn.softmax(w * inv_t, axis=-1), GATE_COEFFS)   # [Dout, 4]
         for w in weights], axis=0).reshape(-1)                     # [60]

    x_t = x.T                                       # [9, B]: batch on lanes

    # Single grid step at small batch (per review); lane-tiled "parallel" grid
    # only when each TensorCore would get >= lane_tile columns of real work.
    if batch % lane_tile == 0 and batch // lane_tile >= 2:
        tile_b, grid = lane_tile, (batch // lane_tile,)
    else:
        tile_b, grid = batch, (1,)

    kernel = functools.partial(_perception_fused_kernel, wiring=wiring)

    out = pl.pallas_call(
        kernel,
        out_shape=jax.ShapeDtypeStruct((1, batch), jnp.float32),
        grid_spec=pltpu.PrefetchScalarGridSpec(
            num_scalar_prefetch=0,
            grid=grid,
            in_specs=[
                pl.BlockSpec(memory_space=pltpu.MemorySpace.SMEM),   # coeffs
                pl.BlockSpec((d_in, tile_b), lambda i: (0, i)),      # x [9,TB]
            ],
            out_specs=pl.BlockSpec((1, tile_b), lambda i: (0, i)),
        ),
        compiler_params=pltpu.CompilerParams(
            dimension_semantics=("parallel",),
        ),
    )(coeffs, x_t)

    return out.reshape(batch, 1)                    # back to [B, 1]


# ----------------------------------------------------------------------------
# Deterministic parameter construction for the [8, 4, 2, 1] chain.
#   wiring  : static python indices (baked into the kernel)
#   weights : per-layer [Dout, 16] f32 gate-mixture logits (traced)
# ----------------------------------------------------------------------------
def build_params(key):
    wiring = []
    weights = []
    for (out_size, in_size) in PERC_SIZES:
        key, k1, k2, k3 = jax.random.split(key, 4)
        a_idx = tuple(int(v) for v in
                      np.asarray(jax.random.randint(k1, (out_size,), 0, in_size)))
        b_idx = tuple(int(v) for v in
                      np.asarray(jax.random.randint(k2, (out_size,), 0, in_size)))
        w = jax.random.normal(k3, (out_size, 16), jnp.float32)
        wiring.append((a_idx, b_idx))
        weights.append(w)
    return tuple(wiring), weights


# Pure-JAX reference (same math, no Pallas) for correctness checking.
def perception_forward_ref(x, weights, *, wiring, temperature=1.0):
    inv_t = 1.0 / float(temperature)
    for (a_idx, b_idx), w in zip(wiring, weights):
        probs = jax.nn.softmax(w * inv_t, axis=-1)              # [Dout, 16]
        c = jnp.dot(probs, GATE_COEFFS)                         # [Dout, 4]
        a = x[:, list(a_idx)]                                   # [B, Dout]
        b = x[:, list(b_idx)]
        x = c[:, 0] + c[:, 1] * a + c[:, 2] * b + c[:, 3] * (a * b)
    return x


if __name__ == "__main__":
    B, INPUT_SIZE = 256, 9          # 256 3x3 neighborhoods

    key = jax.random.PRNGKey(0)
    k_x, k_params = jax.random.split(key)
    x = jax.random.uniform(k_x, (B, INPUT_SIZE), jnp.float32)
    wiring, weights = build_params(k_params)

    fwd = jax.jit(functools.partial(perception_forward,
                                    wiring=wiring, temperature=1.0))
    out = jax.block_until_ready(fwd(x, weights))

    ref = perception_forward_ref(x, weights, wiring=wiring, temperature=1.0)
    assert out.shape == (B, 1)
    np.testing.assert_allclose(np.asarray(out), np.asarray(ref).reshape(B, 1),
                               rtol=1e-5, atol=1e-5)
    print("KERNEL_OK")
</pallas_src>

<mosaic_0001>
module attributes {stable_mosaic.version = 11 : i64} {
  func.func @_perception_fused_kernel(%arg0: i32, %arg1: memref<60xf32, #tpu.memory_space<smem>>, %arg2: memref<9x256xf32, #tpu.memory_space<vmem>>, %arg3: memref<1x256xf32, #tpu.memory_space<vmem>>) attributes {dimension_semantics = [#tpu.dimension_semantics<parallel>], iteration_bounds = array<i64: 1>, scalar_prefetch = 0 : i64, scratch_operands = 0 : i64, tpu.core_type = #tpu.core_type<tc>, window_params = [{transform_indices = @transform_0, window_bounds = array<i64: 60>}, {transform_indices = @transform_1, window_bounds = array<i64: 9, 256>}, {transform_indices = @transform_2, window_bounds = array<i64: 1, 256>}]} {
    %c1 = arith.constant 1 : index
    %c0 = arith.constant 0 : index
    %0 = vector.load %arg2[%c1, %c0] : memref<9x256xf32, #tpu.memory_space<vmem>>, vector<1x256xf32>
    %c2 = arith.constant 2 : index
    %c0_0 = arith.constant 0 : index
    %1 = vector.load %arg2[%c2, %c0_0] : memref<9x256xf32, #tpu.memory_space<vmem>>, vector<1x256xf32>
    %c3 = arith.constant 3 : index
    %c0_1 = arith.constant 0 : index
    %2 = vector.load %arg2[%c3, %c0_1] : memref<9x256xf32, #tpu.memory_space<vmem>>, vector<1x256xf32>
    %c4 = arith.constant 4 : index
    %c0_2 = arith.constant 0 : index
    %3 = vector.load %arg2[%c4, %c0_2] : memref<9x256xf32, #tpu.memory_space<vmem>>, vector<1x256xf32>
    %c7 = arith.constant 7 : index
    %c0_3 = arith.constant 0 : index
    %4 = vector.load %arg2[%c7, %c0_3] : memref<9x256xf32, #tpu.memory_space<vmem>>, vector<1x256xf32>
    %c4_4 = arith.constant 4 : index
    %5 = memref.load %arg1[%c4_4] : memref<60xf32, #tpu.memory_space<smem>>
    %c5 = arith.constant 5 : index
    %6 = memref.load %arg1[%c5] : memref<60xf32, #tpu.memory_space<smem>>
    %c6 = arith.constant 6 : index
    %7 = memref.load %arg1[%c6] : memref<60xf32, #tpu.memory_space<smem>>
    %c7_5 = arith.constant 7 : index
    %8 = memref.load %arg1[%c7_5] : memref<60xf32, #tpu.memory_space<smem>>
    %9 = vector.broadcast %7 : f32 to vector<1x256xf32>
    %10 = arith.mulf %9, %0 : vector<1x256xf32>
    %11 = vector.broadcast %5 : f32 to vector<1x256xf32>
    %12 = arith.addf %11, %10 : vector<1x256xf32>
    %13 = vector.broadcast %8 : f32 to vector<1x256xf32>
    %14 = arith.mulf %13, %0 : vector<1x256xf32>
    %15 = vector.broadcast %6 : f32 to vector<1x256xf32>
    %16 = arith.addf %15, %14 : vector<1x256xf32>
    %17 = arith.mulf %4, %16 : vector<1x256xf32>
    %18 = arith.addf %12, %17 : vector<1x256xf32>
    %c16 = arith.constant 16 : index
    %19 = memref.load %arg1[%c16] : memref<60xf32, #tpu.memory_space<smem>>
    %c17 = arith.constant 17 : index
    %20 = memref.load %arg1[%c17] : memref<60xf32, #tpu.memory_space<smem>>
    %c18 = arith.constant 18 : index
    %21 = memref.load %arg1[%c18] : memref<60xf32, #tpu.memory_space<smem>>
    %c19 = arith.constant 19 : index
    %22 = memref.load %arg1[%c19] : memref<60xf32, #tpu.memory_space<smem>>
    %23 = vector.broadcast %21 : f32 to vector<1x256xf32>
    %24 = arith.mulf %23, %2 : vector<1x256xf32>
    %25 = vector.broadcast %19 : f32 to vector<1x256xf32>
    %26 = arith.addf %25, %24 : vector<1x256xf32>
    %27 = vector.broadcast %22 : f32 to vector<1x256xf32>
    %28 = arith.mulf %27, %2 : vector<1x256xf32>
    %29 = vector.broadcast %20 : f32 to vector<1x256xf32>
    %30 = arith.addf %29, %28 : vector<1x256xf32>
    %31 = arith.mulf %1, %30 : vector<1x256xf32>
    %32 = arith.addf %26, %31 : vector<1x256xf32>
    %c24 = arith.constant 24 : index
    %33 = memref.load %arg1[%c24] : memref<60xf32, #tpu.memory_space<smem>>
    %c25 = arith.constant 25 : index
    %34 = memref.load %arg1[%c25] : memref<60xf32, #tpu.memory_space<smem>>
    %c26 = arith.constant 26 : index
    %35 = memref.load %arg1[%c26] : memref<60xf32, #tpu.memory_space<smem>>
    %c27 = arith.constant 27 : index
    %36 = memref.load %arg1[%c27] : memref<60xf32, #tpu.memory_space<smem>>
    %37 = vector.broadcast %35 : f32 to vector<1x256xf32>
    %38 = arith.mulf %37, %3 : vector<1x256xf32>
    %39 = vector.broadcast %33 : f32 to vector<1x256xf32>
    %40 = arith.addf %39, %38 : vector<1x256xf32>
    %41 = vector.broadcast %36 : f32 to vector<1x256xf32>
    %42 = arith.mulf %41, %3 : vector<1x256xf32>
    %43 = vector.broadcast %34 : f32 to vector<1x256xf32>
    %44 = arith.addf %43, %42 : vector<1x256xf32>
    %45 = arith.mulf %0, %44 : vector<1x256xf32>
    %46 = arith.addf %40, %45 : vector<1x256xf32>
    %c36 = arith.constant 36 : index
    %47 = memref.load %arg1[%c36] : memref<60xf32, #tpu.memory_space<smem>>
    %c37 = arith.constant 37 : index
    %48 = memref.load %arg1[%c37] : memref<60xf32, #tpu.memory_space<smem>>
    %c38 = arith.constant 38 : index
    %49 = memref.load %arg1[%c38] : memref<60xf32, #tpu.memory_space<smem>>
    %c39 = arith.constant 39 : index
    %50 = memref.load %arg1[%c39] : memref<60xf32, #tpu.memory_space<smem>>
    %51 = vector.broadcast %49 : f32 to vector<1x256xf32>
    %52 = arith.mulf %51, %18 : vector<1x256xf32>
    %53 = vector.broadcast %47 : f32 to vector<1x256xf32>
    %54 = arith.addf %53, %52 : vector<1x256xf32>
    %55 = vector.broadcast %50 : f32 to vector<1x256xf32>
    %56 = arith.mulf %55, %18 : vector<1x256xf32>
    %57 = vector.broadcast %48 : f32 to vector<1x256xf32>
    %58 = arith.addf %57, %56 : vector<1x256xf32>
    %59 = arith.mulf %32, %58 : vector<1x256xf32>
    %60 = arith.addf %54, %59 : vector<1x256xf32>
    %c40 = arith.constant 40 : index
    %61 = memref.load %arg1[%c40] : memref<60xf32, #tpu.memory_space<smem>>
    %c41 = arith.constant 41 : index
    %62 = memref.load %arg1[%c41] : memref<60xf32, #tpu.memory_space<smem>>
    %c42 = arith.constant 42 : index
    %63 = memref.load %arg1[%c42] : memref<60xf32, #tpu.memory_space<smem>>
    %c43 = arith.constant 43 : index
    %64 = memref.load %arg1[%c43] : memref<60xf32, #tpu.memory_space<smem>>
    %65 = vector.broadcast %63 : f32 to vector<1x256xf32>
    %66 = arith.mulf %65, %32 : vector<1x256xf32>
    %67 = vector.broadcast %61 : f32 to vector<1x256xf32>
    %68 = arith.addf %67, %66 : vector<1x256xf32>
    %69 = vector.broadcast %64 : f32 to vector<1x256xf32>
    %70 = arith.mulf %69, %32 : vector<1x256xf32>
    %71 = vector.broadcast %62 : f32 to vector<1x256xf32>
    %72 = arith.addf %71, %70 : vector<1x256xf32>
    %73 = arith.mulf %46, %72 : vector<1x256xf32>
    %74 = arith.addf %68, %73 : vector<1x256xf32>
    %c48 = arith.constant 48 : index
    %75 = memref.load %arg1[%c48] : memref<60xf32, #tpu.memory_space<smem>>
    %c49 = arith.constant 49 : index
    %76 = memref.load %arg1[%c49] : memref<60xf32, #tpu.memory_space<smem>>
    %c50 = arith.constant 50 : index
    %77 = memref.load %arg1[%c50] : memref<60xf32, #tpu.memory_space<smem>>
    %c51 = arith.constant 51 : index
    %78 = memref.load %arg1[%c51] : memref<60xf32, #tpu.memory_space<smem>>
    %79 = vector.broadcast %77 : f32 to vector<1x256xf32>
    %80 = arith.mulf %79, %60 : vector<1x256xf32>
    %81 = vector.broadcast %75 : f32 to vector<1x256xf32>
    %82 = arith.addf %81, %80 : vector<1x256xf32>
    %83 = vector.broadcast %78 : f32 to vector<1x256xf32>
    %84 = arith.mulf %83, %60 : vector<1x256xf32>
    %85 = vector.broadcast %76 : f32 to vector<1x256xf32>
    %86 = arith.addf %85, %84 : vector<1x256xf32>
    %87 = arith.mulf %74, %86 : vector<1x256xf32>
    %88 = arith.addf %82, %87 : vector<1x256xf32>
    %c56 = arith.constant 56 : index
    %89 = memref.load %arg1[%c56] : memref<60xf32, #tpu.memory_space<smem>>
    %c57 = arith.constant 57 : index
    %90 = memref.load %arg1[%c57] : memref<60xf32, #tpu.memory_space<smem>>
    %c58 = arith.constant 58 : index
    %91 = memref.load %arg1[%c58] : memref<60xf32, #tpu.memory_space<smem>>
    %c59 = arith.constant 59 : index
    %92 = memref.load %arg1[%c59] : memref<60xf32, #tpu.memory_space<smem>>
    %93 = vector.broadcast %91 : f32 to vector<1x256xf32>
    %94 = arith.mulf %93, %88 : vector<1x256xf32>
    %95 = vector.broadcast %89 : f32 to vector<1x256xf32>
    %96 = arith.addf %95, %94 : vector<1x256xf32>
    %97 = vector.broadcast %92 : f32 to vector<1x256xf32>
    %98 = arith.mulf %97, %88 : vector<1x256xf32>
    %99 = vector.broadcast %90 : f32 to vector<1x256xf32>
    %100 = arith.addf %99, %98 : vector<1x256xf32>
    %101 = arith.mulf %88, %100 : vector<1x256xf32>
    %102 = arith.addf %96, %101 : vector<1x256xf32>
    %c0_6 = arith.constant 0 : index
    %c0_7 = arith.constant 0 : index
    %103 = vector.load %arg3[%c0_6, %c0_7] : memref<1x256xf32, #tpu.memory_space<vmem>>, vector<1x256xf32>
    tpu.vector_store %arg3[%c0_6, %c0_7], %102 {strides = array<i32>} : memref<1x256xf32, #tpu.memory_space<vmem>>, vector<1x256xf32>,
    return
  }
  func.func @transform_0(%arg0: i32) -> i32 {
    %c0_i32 = arith.constant 0 : i32
    %c0_i32_0 = arith.constant 0 : i32
    return %c0_i32 : i32
  }
  func.func @transform_1(%arg0: i32) -> (i32, i32) {
    %c0_i32 = arith.constant 0 : i32
    %c0_i32_0 = arith.constant 0 : i32
    return %c0_i32, %arg0 : i32, i32
  }
  func.func @transform_2(%arg0: i32) -> (i32, i32) {
    %c0_i32 = arith.constant 0 : i32
    %c0_i32_0 = arith.constant 0 : i32
    return %c0_i32, %arg0 : i32, i32
  }
}

</mosaic_0001>

<bundles_post_ra>
// kernel: perception_forward.1
= control target key start
LH: loop header
LB: loop body
LE: loop exit
PB: predicated region body
PF: predicated region fallthrough
CT: control target
= control target key end

     0   :  { %7 = vsyncpa [#allocation4], 0  ;;  %s324_s0 = inlined_call_operand.vmem [shape: f32[60], index: 0, kind: input, shape index: {}]   ;;  %s325_s1 = inlined_call_operand.vmem [shape: f32[9,256], index: 1, kind: input, shape index: {}]   ;;  %s326_s2 = inlined_call_operand.hbm [shape: f32[1,256], index: 2, kind: output, shape index: {}]  }
   0x1   :  { %8 = vsyncpa [#allocation3], 0  ;;  %s15_s11 = sshll.u32 %s324_s0, 4  ;;  %s16_s11 = int_to_ptr.vmem [resolvable:$true] %s15_s11 }
   0x2   :  { %s188_s12 = scalar_lea.vmem %s16_s11, 16  ;;  %p193_p1 = scmp.lt.s32.totalorder %s16_s11, %s16_s11 }
   0x3   :  { %p189_p0 = scmp.ne.s32.totalorder %s16_s11, %s188_s12  ;;  %p194_p2 = scmp.lt.s32.totalorder %s188_s12, %s188_s12 }
   0x5   :  { %p195_p3 = por %p194_p2, %p193_p1 }
   0x7   :  { %p196_p4 = pnand %p195_p3, %p189_p0 }
   0x9   :  { %199 = shalt.err (!%p196_p4)
}
   0xa   :  { %s226_s13 = smov [#allocation2]  }
   0xb   :  { %18 = dma.vmem_to_smem %s16_s11, 16, %s226_s13, [#allocation4]  }
   0xc   :  { %222 = dma.done.wait [#allocation4], 16  }
   0xd   :  { %223 = vsyncadd [#allocation4], 4294967280 }
   0xe   :  { %24 = sfence }
   0xf   :  { %s246_s14 = sld [smem:[#allocation2 + $0x4]]  ;;  %s248_s15 = sld [smem:[#allocation2 + $0x5]]  ;;  %v153_v0 = vld [vmem:[%s325_s1 + $0x1] ss:$8 sm:$0x3] }
  0x10   :  { %s160_s16 = sld [smem:[#allocation2 + $0x6]]  ;;  %s161_s17 = sld [smem:[#allocation2 + $0x7]]  ;;  %v155_v1 = vld [vmem:[%s325_s1 + $0x3] ss:$8 sm:$0x3] }
  0x11   :  { %s250_s0 = sld [smem:[#allocation2 + $0x10]]  ;;  %s252_s18 = sld [smem:[#allocation2 + $0x11]]  ;;  %v156_v3 = vld [vmem:[%s325_s1 + $0x4] ss:$8 sm:$0x3] }
  0x12   :  { %s164_s19 = sld [smem:[#allocation2 + $0x12]]  ;;  %s165_s22 = sld [smem:[#allocation2 + $0x13]]  ;;  %v157_v8 = vld [vmem:[%s325_s1 + $0x7] ss:$8 sm:$0x3] }
  0x13   :  { %s257_s23 = sld [smem:[#allocation2 + $0x18]]  ;;  %s259_s24 = sld [smem:[#allocation2 + $0x19]]  ;;  %v154_v19 = vld [vmem:[%s325_s1 + $0x2] ss:$8 sm:$0x3] }
  0x14   :  { %s168_s25 = sld [smem:[#allocation2 + $0x1a]]  ;;  %s264_s28 = sld [smem:[#allocation2 + $0x1b]] }
  0x15   :  { %s266_s29 = sld [smem:[#allocation2 + $0x24]]  ;;  %s268_s30 = sld [smem:[#allocation2 + $0x26]]  ;;  %v41_v5 = vstv %s246_s14  ;;  %v45_v7 = vstv %s248_s15 }
  0x16   :  { %v39_v2 = vstv %s160_s16  ;;  %v43_v6 = vstv %s161_s17  ;;  %s275_s5 = sld [smem:[#allocation2 + $0x25]]  ;;  %s277_s6 = sld [smem:[#allocation2 + $0x27]] }
  0x17   :  { %v40_v4 = vmul.f32 %v153_v0, %v39_v2  ;;  %v44_v9 = vmul.f32 %v153_v0, %v43_v6  ;;  %s282_s9 = sld [smem:[#allocation2 + $0x2a]]  ;;  %v55_v12 = vstv %s250_s0  ;;  %v59_v14 = vstv %s252_s18  ;;  %s286_s10 = sld [smem:[#allocation2 + $0x28]] }
  0x18   :  { %v53_v10 = vstv %s164_s19  ;;  %v57_v13 = vstv %s165_s22  ;;  %s288_s11 = sld [smem:[#allocation2 + $0x2b]]  ;;  %s290_s12 = sld [smem:[#allocation2 + $0x29]] }
  0x19   :  { %v54_v11 = vmul.f32 %v155_v1, %v53_v10  ;;  %v42_v15 = vadd.f32 %v41_v5, %v40_v4  ;;  %v46_v16 = vadd.f32 %v45_v7, %v44_v9  ;;  %v58_v17 = vmul.f32 %v155_v1, %v57_v13  ;;  %s300_s15 = sld [smem:[#allocation2 + $0x32]]  ;;  %s302_s16 = sld [smem:[#allocation2 + $0x33]] }
  0x1a   :  { %v67_v18 = vstv %s168_s25  ;;  %v69_v21 = vstv %s257_s23  ;;  %v71_v22 = vstv %s264_s28  ;;  %v73_v23 = vstv %s259_s24  ;;  %s178_s1 = sld [smem:[#allocation2 + $0x30]]  ;;  %s179_s17 = sld [smem:[#allocation2 + $0x31]] }
  0x1b   :  { %v68_v20 = vmul.f32 %v156_v3, %v67_v18  ;;  %v47_v24 = vmul.f32 %v157_v8, %v46_v16  ;;  %v56_v25 = vadd.f32 %v55_v12, %v54_v11  ;;  %v60_v26 = vadd.f32 %v59_v14, %v58_v17  ;;  %s184_s0 = sld [smem:[#allocation2 + $0x3a]]  ;;  %s185_s18 = sld [smem:[#allocation2 + $0x3b]] }
  0x1c   :  { %v72_v27 = vmul.f32 %v156_v3, %v71_v22  ;;  %v81_v28 = vstv %s268_s30  ;;  %v85_v29 = vstv %s277_s6  ;;  %v83_v33 = vstv %s266_s29  ;;  %s182_s19 = sld [smem:[#allocation2 + $0x38]]  ;;  %s183_s20 = sld [smem:[#allocation2 + $0x39]] }
  0x1d   :  { %v48_v30 = vadd.f32 %v47_v24, %v42_v15  ;;  %v61_v31 = vmul.f32 %v154_v19, %v60_v26  ;;  %v70_v34 = vadd.f32 %v69_v21, %v68_v20  ;;  %v87_v35 = vstv %s275_s5  ;;  %s227_s21 = smov [#allocation5]  }
  0x1e   :  { %v74_v32 = vadd.f32 %v73_v23, %v72_v27  ;;  %v95_v36 = vstv %s282_s9  ;;  %v99_v37 = vstv %s288_s11  ;;  %v97_v42 = vstv %s286_s10  ;;  %s144_s22 = sshll.u32 %s227_s21, 4  ;;  %s145_s22 = int_to_ptr.vmem [resolvable:$true] %s144_s22 }
  0x1f   :  { %v62_v38 = vadd.f32 %v61_v31, %v56_v25  ;;  %v82_v40 = vmul.f32 %v81_v28, %v48_v30  ;;  %v86_v41 = vmul.f32 %v85_v29, %v48_v30  ;;  %v101_v46 = vstv %s290_s12  ;;  %s200_s23 = scalar_lea.vmem %s145_s22, 32  ;;  %p205_p6 = scmp.lt.s32.totalorder %s145_s22, %s145_s22 }
  0x20   :  { %v75_v39 = vmul.f32 %v153_v0, %v74_v32  ;;  %v109_v52 = vstv %s300_s15  ;;  %v113_v53 = vstv %s302_s16  ;;  %v111_v56 = vstv %s178_s1  ;;  %p201_p5 = scmp.ne.s32.totalorder %s145_s22, %s200_s23  ;;  %p206_p7 = scmp.lt.s32.totalorder %s200_s23, %s200_s23 }
  0x21   :  { %v84_v43 = vadd.f32 %v83_v33, %v82_v40  ;;  %v88_v44 = vadd.f32 %v87_v35, %v86_v41  ;;  %v96_v45 = vmul.f32 %v95_v36, %v62_v38  ;;  %v100_v48 = vmul.f32 %v99_v37, %v62_v38 }
  0x22   :  { %v76_v47 = vadd.f32 %v75_v39, %v70_v34  ;;  %v115_v57 = vstv %s179_s17  ;;  %v123_v0 = vstv %s184_s0  ;;  %v127_v1 = vstv %s185_s18  ;;  %p207_p8 = por %p206_p7, %p205_p6 }
  0x23   :  { %v89_v49 = vmul.f32 %v88_v44, %v62_v38  ;;  %v98_v50 = vadd.f32 %v97_v42, %v96_v45  ;;  %v102_v51 = vadd.f32 %v101_v46, %v100_v48  ;;  %v125_v3 = vstv %s182_s19 }
  0x24   :  { %v129_v4 = vstv %s183_s20  ;;  %v133_v7 = vlaneseq  ;;  %p208_p9 = pnand %p207_p8, %p201_p5 }
  0x25   :  { %v90_v54 = vadd.f32 %v89_v49, %v84_v43  ;;  %v103_v55 = vmul.f32 %v102_v51, %v76_v47 }
  0x26   :  { %vm135_vm0 = vcmp.lt.s32.totalorder %v133_v7, 256 }
  0x27   :  { %v110_v58 = vmul.f32 %v109_v52, %v90_v54  ;;  %v114_v59 = vmul.f32 %v113_v53, %v90_v54  ;;  %v104_v60 = vadd.f32 %v103_v55, %v98_v50 }
  0x29   :  { %v112_v61 = vadd.f32 %v111_v56, %v110_v58  ;;  %v116_v62 = vadd.f32 %v115_v57, %v114_v59 }
  0x2b   :  { %v117_v63 = vmul.f32 %v116_v62, %v104_v60 }
  0x2d   :  { %v118_v2 = vadd.f32 %v117_v63, %v112_v61 }
  0x2f   :  { %v124_v5 = vmul.f32 %v123_v0, %v118_v2  ;;  %v128_v6 = vmul.f32 %v127_v1, %v118_v2 }
  0x31   :  { %v126_v8 = vadd.f32 %v125_v3, %v124_v5  ;;  %v130_v9 = vadd.f32 %v129_v4, %v128_v6 }
  0x33   :  { %v131_v10 = vmul.f32 %v130_v9, %v118_v2 }
  0x35   :  { %v132_v11 = vadd.f32 %v131_v10, %v126_v8 }
  0x37   :  { %137 = vst.msk [vmem:[#allocation5] sm:$0x3] %vm135_vm0, %v132_v11 }
  0x38   :  { %211 = shalt.err (!%p208_p9)
}
  0x39   :  { %s212_s26 = scalar_lea.hbm %s326_s2, 32 }
  0x3a   :  { %p213_p10 = scmp.ne.s32.totalorder %s326_s2, %s212_s26  ;;  %p216_p11 = scmp.lt.u32.totalorder %s212_s26, %s326_s2 }
  0x3c   :  { %p218_p12 = pnand %p216_p11, %p213_p10 }
  0x3e   :  { %221 = shalt.err (!%p218_p12)
}
  0x3f   :  { %147 = dma.vmem_to_hbm [thread:$0]  %s145_s22, 32, %s326_s2, [#allocation3]  }
  0x40   :  { %224 = dma.done.wait [#allocation3], 32  }
  0x41   :  { %225 = vsyncadd [#allocation3], 4294967264 }
  0x42   :  { %151 = vsyncpa [#allocation3], 1 }
  0x43   :  { %152 = vsyncpa [#allocation4], 1 }

</bundles_post_ra>
